<compile_context>
chip_gen: v7x
topology: tpu7x:2x2x1
jax: 0.10.0
libtpu: 0.0.40
codegen_flags: <defaults>
</compile_context>

<pallas_src>
import functools

import jax
import jax.numpy as jnp
from jax.experimental import pallas as pl
from jax.experimental.pallas import tpu as pltpu


def _round_up(x, m):
    return ((x + m - 1) // m) * m


# ----------------------------------------------------------------------------
# Fused kernel: whole MLP for one batch tile, weights resident in VMEM
# ----------------------------------------------------------------------------
def mlp_fused_kernel(x_ref, w_in_ref, w_hid_ref, b_hid_ref, w_out_ref, b_out_ref,
                     o_ref, *, num_hidden_matmuls):
    # Biases for all hidden-producing layers, small and resident: (L, Hp).
    b_all = b_hid_ref[...]

    # Layer 0: (tm, Kp) @ (Kp, Hp) + b0, ReLU.  (Dropout is identity in eval.)
    h = jnp.dot(x_ref[...], w_in_ref[...], preferred_element_type=jnp.float32)
    h = jnp.maximum(h + b_all[0:1, :], 0.0)

    # Hidden -> hidden layers (statically unrolled; weights already in VMEM).
    for l in range(num_hidden_matmuls):
        h = jnp.dot(h, w_hid_ref[l], preferred_element_type=jnp.float32)
        h = jnp.maximum(h + b_all[l + 1:l + 2, :], 0.0)

    # Final Linear(hidden -> output_dim), no activation. Single lane-dense store.
    out = jnp.dot(h, w_out_ref[...], preferred_element_type=jnp.float32) + b_out_ref[...]
    o_ref[...] = out.astype(o_ref.dtype)


# ----------------------------------------------------------------------------
# Forward wrapper: pad batch/input once per call, launch one fused pallas_call
# ----------------------------------------------------------------------------
def mlp_forward(x, w_in, w_hid, b_hid, w_out, b_out, *, num_hidden_matmuls, output_dim):
    x = x.astype(jnp.float32)
    M, K = x.shape
    Kp, Hp = w_in.shape
    Op = w_out.shape[1]

    # Batch tiling: tm multiple of 8; expose >=2 grid blocks when possible so
    # the "parallel" axis actually engages both TensorCores on v7x.
    tm = min(256, _round_up(M, 8))
    Mp = _round_up(M, tm)
    if Mp == tm and M >= 16:
        tm = _round_up((M + 1) // 2, 8)
        Mp = _round_up(M, tm)

    # Zero-padding is exact for Linear: padded K columns contribute 0, padded
    # M rows / output columns are sliced off below.
    xp = jnp.pad(x, ((0, Mp - M), (0, Kp - K)))

    grid = (Mp // tm,)
    kernel = functools.partial(mlp_fused_kernel, num_hidden_matmuls=num_hidden_matmuls)

    out = pl.pallas_call(
        kernel,
        out_shape=jax.ShapeDtypeStruct((Mp, Op), jnp.float32),
        grid_spec=pltpu.PrefetchScalarGridSpec(
            num_scalar_prefetch=0,
            grid=grid,
            in_specs=[
                pl.BlockSpec((tm, Kp), lambda i: (i, 0)),          # x batch tile
                pl.BlockSpec(w_in.shape, lambda i: (0, 0)),        # W0 (resident)
                pl.BlockSpec(w_hid.shape, lambda i: (0, 0, 0)),    # stacked hidden W
                pl.BlockSpec(b_hid.shape, lambda i: (0, 0)),       # stacked hidden b
                pl.BlockSpec(w_out.shape, lambda i: (0, 0)),       # final W
                pl.BlockSpec(b_out.shape, lambda i: (0, 0)),       # final b
            ],
            out_specs=pl.BlockSpec((tm, Op), lambda i: (i, 0)),
        ),
        compiler_params=pltpu.CompilerParams(
            dimension_semantics=("parallel",),
            vmem_limit_bytes=48 * 1024 * 1024,   # safe on v7x (64 MiB physical)
        ),
    )(xp, w_in, w_hid, b_hid, w_out, b_out)
    return out[:M, :output_dim]


# ----------------------------------------------------------------------------
# Parameters: xavier weights, zero bias (PyTorch layout), packed & padded once
# ----------------------------------------------------------------------------
def xavier_uniform(key, fan_in, fan_out):
    limit = jnp.sqrt(6.0 / (fan_in + fan_out))
    return jax.random.uniform(key, (fan_in, fan_out), jnp.float32, -limit, limit)


def init_mlp_params(key, input_dim, hidden_dim, output_dim, num_layers):
    # fcs: num_layers Linear layers producing hidden_dim, then Linear(hidden -> output_dim).
    dims = [input_dim] + [hidden_dim] * num_layers + [output_dim]
    params = []
    for i in range(len(dims) - 1):
        key, kw = jax.random.split(key)
        params.append(dict(
            w=xavier_uniform(kw, dims[i], dims[i + 1]),   # stored as [in, out]
            b=jnp.zeros((dims[i + 1],), jnp.float32),
        ))
    return params


def pack_params(params, input_dim, hidden_dim, output_dim):
    """Pad + stack parameters once (outside the forward hot path)."""
    num_fcs = len(params)
    num_hidden = num_fcs - 1                       # layers with ReLU
    Kp = _round_up(input_dim, 128)
    Hp = _round_up(hidden_dim, 128)
    Op = _round_up(output_dim, 128)

    w_in = jnp.pad(params[0]["w"], ((0, Kp - input_dim), (0, Hp - hidden_dim)))
    b_hid = jnp.stack([jnp.pad(params[i]["b"], (0, Hp - hidden_dim))
                       for i in range(num_hidden)])
    if num_hidden > 1:
        w_hid = jnp.stack([jnp.pad(params[i]["w"],
                                   ((0, Hp - hidden_dim), (0, Hp - hidden_dim)))
                           for i in range(1, num_hidden)])
    else:
        w_hid = jnp.zeros((1, Hp, Hp), jnp.float32)   # dummy, never read
    w_out = jnp.pad(params[-1]["w"], ((0, Hp - hidden_dim), (0, Op - output_dim)))
    b_out = jnp.pad(params[-1]["b"].reshape(1, -1), ((0, 0), (0, Op - output_dim)))
    return dict(w_in=w_in, w_hid=w_hid, b_hid=b_hid, w_out=w_out, b_out=b_out,
                num_hidden_matmuls=num_hidden - 1)


def mlp_reference(x, params):
    """Pure-JAX reference matching PyTorch eval-mode forward."""
    h = x.astype(jnp.float32)
    for p in params[:-1]:
        h = jnp.maximum(jnp.dot(h, p["w"], precision="highest") + p["b"], 0.0)
    return jnp.dot(h, params[-1]["w"], precision="highest") + params[-1]["b"]


# TODO(synk): weights_init 'he' branch, reset_parameters and the MSE loss()
# method are training/host utilities, not part of the forward pass.


# ----------------------------------------------------------------------------
# Demo
# ----------------------------------------------------------------------------
if __name__ == "__main__":
    key = jax.random.PRNGKey(0)

    batch = 16
    input_dim = 32
    hidden_dim = 64
    output_dim = 1
    num_layers = 3   # 3x (Linear + ReLU), then Linear(hidden -> 1)

    k_x, k_params = jax.random.split(key)
    x = jax.random.normal(k_x, (batch, input_dim), jnp.float32)
    params = init_mlp_params(k_params, input_dim, hidden_dim, output_dim, num_layers)
    packed = pack_params(params, input_dim, hidden_dim, output_dim)

    forward = jax.jit(functools.partial(
        mlp_forward,
        num_hidden_matmuls=packed["num_hidden_matmuls"],
        output_dim=output_dim,
    ))
    out = forward(x, packed["w_in"], packed["w_hid"], packed["b_hid"],
                  packed["w_out"], packed["b_out"])
    out = jax.block_until_ready(out)

    ref = mlp_reference(x, params)
    assert out.shape == (batch, output_dim), out.shape
    assert bool(jnp.all(jnp.isfinite(out)))
    assert bool(jnp.allclose(out, ref, atol=5e-2, rtol=5e-2))
    print("KERNEL_OK")
</pallas_src>

<mosaic_0001>
module attributes {stable_mosaic.version = 11 : i64} {
  func.func @mlp_fused_kernel(%arg0: i32, %arg1: memref<8x128xf32, #tpu.memory_space<vmem>>, %arg2: memref<128x128xf32, #tpu.memory_space<vmem>>, %arg3: memref<2x128x128xf32, #tpu.memory_space<vmem>>, %arg4: memref<3x128xf32, #tpu.memory_space<vmem>>, %arg5: memref<128x128xf32, #tpu.memory_space<vmem>>, %arg6: memref<1x128xf32, #tpu.memory_space<vmem>>, %arg7: memref<8x128xf32, #tpu.memory_space<vmem>>) attributes {dimension_semantics = [#tpu.dimension_semantics<parallel>], iteration_bounds = array<i64: 2>, scalar_prefetch = 0 : i64, scratch_operands = 0 : i64, tpu.core_type = #tpu.core_type<tc>, window_params = [{transform_indices = @transform_0, window_bounds = array<i64: 8, 128>}, {pipeline_mode = #tpu.pipeline_mode<synchronous>, transform_indices = @transform_1, window_bounds = array<i64: 128, 128>}, {pipeline_mode = #tpu.pipeline_mode<synchronous>, transform_indices = @transform_2, window_bounds = array<i64: 2, 128, 128>}, {pipeline_mode = #tpu.pipeline_mode<synchronous>, transform_indices = @transform_3, window_bounds = array<i64: 3, 128>}, {pipeline_mode = #tpu.pipeline_mode<synchronous>, transform_indices = @transform_4, window_bounds = array<i64: 128, 128>}, {pipeline_mode = #tpu.pipeline_mode<synchronous>, transform_indices = @transform_5, window_bounds = array<i64: 1, 128>}, {transform_indices = @transform_6, window_bounds = array<i64: 8, 128>}]} {
    %c0 = arith.constant 0 : index
    %c0_0 = arith.constant 0 : index
    %0 = vector.load %arg4[%c0, %c0_0] : memref<3x128xf32, #tpu.memory_space<vmem>>, vector<3x128xf32>
    %c0_1 = arith.constant 0 : index
    %c0_2 = arith.constant 0 : index
    %1 = vector.load %arg1[%c0_1, %c0_2] : memref<8x128xf32, #tpu.memory_space<vmem>>, vector<8x128xf32>
    %c0_3 = arith.constant 0 : index
    %c0_4 = arith.constant 0 : index
    %2 = vector.load %arg2[%c0_3, %c0_4] : memref<128x128xf32, #tpu.memory_space<vmem>>, vector<128x128xf32>
    %cst = arith.constant dense<0.000000e+00> : vector<8x128xf32>
    %3 = tpu.matmul %1, %2, %cst {dimension_numbers = #tpu.dot_dimension_numbers<[1], [0], [0], [1], [0, 0, 1, 1], [], []>} : vector<8x128xf32>, vector<128x128xf32>, vector<8x128xf32> -> vector<8x128xf32>
    %4 = vector.extract_strided_slice %0 {offsets = [0, 0], sizes = [1, 128], strides = [1, 1]} : vector<3x128xf32> to vector<1x128xf32>
    %5 = vector.broadcast %4 : vector<1x128xf32> to vector<8x128xf32>
    %6 = arith.addf %3, %5 : vector<8x128xf32>
    %cst_5 = arith.constant 0.000000e+00 : f32
    %7 = vector.broadcast %cst_5 : f32 to vector<8x128xf32>
    %8 = arith.maximumf %6, %7 : vector<8x128xf32>
    %c0_6 = arith.constant 0 : index
    %c0_7 = arith.constant 0 : index
    %c0_8 = arith.constant 0 : index
    %9 = vector.load %arg3[%c0_6, %c0_7, %c0_8] : memref<2x128x128xf32, #tpu.memory_space<vmem>>, vector<1x128x128xf32>
    %10 = vector.shape_cast %9 : vector<1x128x128xf32> to vector<128x128xf32>
    %cst_9 = arith.constant dense<0.000000e+00> : vector<8x128xf32>
    %11 = tpu.matmul %8, %10, %cst_9 {dimension_numbers = #tpu.dot_dimension_numbers<[1], [0], [0], [1], [0, 0, 1, 1], [], []>} : vector<8x128xf32>, vector<128x128xf32>, vector<8x128xf32> -> vector<8x128xf32>
    %12 = vector.extract_strided_slice %0 {offsets = [1, 0], sizes = [1, 128], strides = [1, 1]} : vector<3x128xf32> to vector<1x128xf32>
    %13 = vector.broadcast %12 : vector<1x128xf32> to vector<8x128xf32>
    %14 = arith.addf %11, %13 : vector<8x128xf32>
    %cst_10 = arith.constant 0.000000e+00 : f32
    %15 = vector.broadcast %cst_10 : f32 to vector<8x128xf32>
    %16 = arith.maximumf %14, %15 : vector<8x128xf32>
    %c1 = arith.constant 1 : index
    %c0_11 = arith.constant 0 : index
    %c0_12 = arith.constant 0 : index
    %17 = vector.load %arg3[%c1, %c0_11, %c0_12] : memref<2x128x128xf32, #tpu.memory_space<vmem>>, vector<1x128x128xf32>
    %18 = vector.shape_cast %17 : vector<1x128x128xf32> to vector<128x128xf32>
    %cst_13 = arith.constant dense<0.000000e+00> : vector<8x128xf32>
    %19 = tpu.matmul %16, %18, %cst_13 {dimension_numbers = #tpu.dot_dimension_numbers<[1], [0], [0], [1], [0, 0, 1, 1], [], []>} : vector<8x128xf32>, vector<128x128xf32>, vector<8x128xf32> -> vector<8x128xf32>
    %20 = vector.extract_strided_slice %0 {offsets = [2, 0], sizes = [1, 128], strides = [1, 1]} : vector<3x128xf32> to vector<1x128xf32>
    %21 = vector.broadcast %20 : vector<1x128xf32> to vector<8x128xf32>
    %22 = arith.addf %19, %21 : vector<8x128xf32>
    %cst_14 = arith.constant 0.000000e+00 : f32
    %23 = vector.broadcast %cst_14 : f32 to vector<8x128xf32>
    %24 = arith.maximumf %22, %23 : vector<8x128xf32>
    %c0_15 = arith.constant 0 : index
    %c0_16 = arith.constant 0 : index
    %25 = vector.load %arg5[%c0_15, %c0_16] : memref<128x128xf32, #tpu.memory_space<vmem>>, vector<128x128xf32>
    %cst_17 = arith.constant dense<0.000000e+00> : vector<8x128xf32>
    %26 = tpu.matmul %24, %25, %cst_17 {dimension_numbers = #tpu.dot_dimension_numbers<[1], [0], [0], [1], [0, 0, 1, 1], [], []>} : vector<8x128xf32>, vector<128x128xf32>, vector<8x128xf32> -> vector<8x128xf32>
    %c0_18 = arith.constant 0 : index
    %c0_19 = arith.constant 0 : index
    %27 = vector.load %arg6[%c0_18, %c0_19] : memref<1x128xf32, #tpu.memory_space<vmem>>, vector<1x128xf32>
    %28 = vector.broadcast %27 : vector<1x128xf32> to vector<8x128xf32>
    %29 = arith.addf %26, %28 : vector<8x128xf32>
    %c0_20 = arith.constant 0 : index
    %c0_21 = arith.constant 0 : index
    %30 = vector.load %arg7[%c0_20, %c0_21] : memref<8x128xf32, #tpu.memory_space<vmem>>, vector<8x128xf32>
    tpu.vector_store %arg7[%c0_20, %c0_21], %29 {strides = array<i32>} : memref<8x128xf32, #tpu.memory_space<vmem>>, vector<8x128xf32>,
    return
  }
  func.func @transform_0(%arg0: i32) -> (i32, i32) {
    %c0_i32 = arith.constant 0 : i32
    %c0_i32_0 = arith.constant 0 : i32
    return %arg0, %c0_i32 : i32, i32
  }
  func.func @transform_1(%arg0: i32) -> (i32, i32) {
    %c0_i32 = arith.constant 0 : i32
    %c0_i32_0 = arith.constant 0 : i32
    %c0_i32_1 = arith.constant 0 : i32
    return %c0_i32, %c0_i32_0 : i32, i32
  }
  func.func @transform_2(%arg0: i32) -> (i32, i32, i32) {
    %c0_i32 = arith.constant 0 : i32
    %c0_i32_0 = arith.constant 0 : i32
    %c0_i32_1 = arith.constant 0 : i32
    %c0_i32_2 = arith.constant 0 : i32
    return %c0_i32, %c0_i32_0, %c0_i32_1 : i32, i32, i32
  }
  func.func @transform_3(%arg0: i32) -> (i32, i32) {
    %c0_i32 = arith.constant 0 : i32
    %c0_i32_0 = arith.constant 0 : i32
    %c0_i32_1 = arith.constant 0 : i32
    return %c0_i32, %c0_i32_0 : i32, i32
  }
  func.func @transform_4(%arg0: i32) -> (i32, i32) {
    %c0_i32 = arith.constant 0 : i32
    %c0_i32_0 = arith.constant 0 : i32
    %c0_i32_1 = arith.constant 0 : i32
    return %c0_i32, %c0_i32_0 : i32, i32
  }
  func.func @transform_5(%arg0: i32) -> (i32, i32) {
    %c0_i32 = arith.constant 0 : i32
    %c0_i32_0 = arith.constant 0 : i32
    %c0_i32_1 = arith.constant 0 : i32
    return %c0_i32, %c0_i32_0 : i32, i32
  }
  func.func @transform_6(%arg0: i32) -> (i32, i32) {
    %c0_i32 = arith.constant 0 : i32
    %c0_i32_0 = arith.constant 0 : i32
    return %arg0, %c0_i32 : i32, i32
  }
}

</mosaic_0001>

<bundles_post_ra>
// kernel: mlp_forward.1
= control target key start
LH: loop header
LB: loop body
LE: loop exit
PB: predicated region body
PF: predicated region fallthrough
CT: control target
= control target key end

     0   :  { %11 = vsyncpa [#allocation3], 0  ;;  %s1432_s0 = inlined_call_operand.vmem [shape: f32[16,128], index: 0, kind: input, shape index: {}]   ;;  %s1433_s1 = inlined_call_operand.hbm [shape: f32[128,128], index: 1, kind: input, shape index: {}]   ;;  %s1434_s2 = inlined_call_operand.hbm [shape: f32[2,128,128], index: 2, kind: input, shape index: {}]   ;;  %s1435_s3 = inlined_call_operand.vmem [shape: f32[3,128], index: 3, kind: input, shape index: {}]   ;;  %s1436_s4 = inlined_call_operand.hbm [shape: f32[128,128], index: 4, kind: input, shape index: {}]   ;;  %s1437_s5 = inlined_call_operand.vmem [shape: f32[1,128], index: 5, kind: input, shape index: {}]   ;;  %s1438_s6 = inlined_call_operand.vmem [shape: f32[16,128], index: 6, kind: output, shape index: {}]  }
   0x1   :  { %12 = vsyncpa [#allocation5], 0  ;;  %s1252_s21 = smov 0  }
   0x2 LB: > { %s1258_s22 = sadd.s32 4294967295, %s1207_s21   ;;  %p747_p0 = scmp.ge.s32.totalorder %s1207_s21, 1  ;;  %s1207_s21 = sphi %s1252_s21, %s18_s21  }
   0x3   : > { %p180_p1 = scmp.lt.s32.totalorder %s1207_s21, 3  ;;  %p1439_p2 = scmp.eq.s32.totalorder %s1258_s22, 0 }
   0x4   : > { %s1209_s24 = smov [#allocation4]   ;;  %s1210_s26 = smov [#allocation2]  }
   0x5   : > { %p1263_p3 = pnand %p747_p0, %p180_p1  ;;  %s205_s25 = sshll.u32 %s1209_s24, 4  ;;  %s206_s25 = int_to_ptr.vmem [resolvable:$true] %s205_s25 }
   0x6   : > { %s192_s27 = sshll.u32 %s1210_s26, 4  ;;  %s1211_s29 = smov [#allocation6]   ;;  %s1275_s27 = int_to_ptr.vmem [resolvable:$true] %s192_s27 }
   0x7   : > { %s1441_s23 = scalar_select %p1263_p3, 1, 0 }
   0x8   : > { %p1077_p4 = pneg %p1263_p3  ;;  %s221_s30 = sshll.u32 %s1211_s29, 4  ;;  %s1277_s30 = int_to_ptr.vmem [resolvable:$true] %s221_s30 }
   0x9   : > { %s1109_s9 = scalar_lea.hbm %s1434_s2, 4096 }
   0xa   : > { %p1271_p5 = pnand %p1439_p2, %p1077_p4  ;;  %p1110_p6 = scmp.ne.s32.totalorder %s1434_s2, %s1109_s9 }
   0xb   : > { %p1116_p10 = scmp.lt.u32.totalorder %s1109_s9, %s1434_s2 }
   0xc   : > { %p1287_p7 = pneg %p1271_p5 }
   0xe   : > { %p1112_p8 = pnand %p1287_p7, %p1110_p6 }
  0x10   : > { %p1113_p9 = pneg %p1112_p8 }
  0x12   : > { %p1118_p11 = pnand %p1116_p10, %p1113_p9 }
  0x14   : > { %1121 = shalt.err (!%p1118_p11)
}
  0x15   : > { %s1122_s15 = scalar_lea.vmem %s206_s25, 4096  ;;  %p1130_p1 = scmp.lt.s32.totalorder %s206_s25, %s206_s25 }
  0x16   : > { %p1123_p12 = scmp.ne.s32.totalorder %s206_s25, %s1122_s15  ;;  %p1131_p4 = scmp.lt.s32.totalorder %s1122_s15, %s1122_s15 }
  0x18   : > { %p1125_p13 = pnand %p1123_p12, %p1287_p7  ;;  %p1132_p2 = por %p1131_p4, %p1130_p1 }
  0x1a   : > { %p1126_p0 = pneg %p1125_p13 }
  0x1c   : > { %p1133_p3 = pnand %p1132_p2, %p1126_p0 }
  0x1e   : > { %1136 = shalt.err (!%p1133_p3)
}
  0x1f   : > { %s1212_s16 = smov 128   ;;  %s1213_s17 = smov 8  }
  0x20   : > { %1083 = dma.hbm_to_vmem [thread:$0]  (!%p1271_p5), %s1434_s2, 4096, %s206_s25, [#allocation5], %s1212_s16, %s1212_s16, %s1213_s17  }
  0x21   : > { %s1137_s26 = scalar_lea.hbm %s1433_s1, 2048 }
  0x22   : > { %p1138_p2 = scmp.ne.s32.totalorder %s1433_s1, %s1137_s26  ;;  %p1144_p8 = scmp.lt.u32.totalorder %s1137_s26, %s1433_s1 }
  0x24   : > { %p1140_p3 = pnand %p1138_p2, %p1287_p7 }
  0x26   : > { %p1141_p6 = pneg %p1140_p3 }
  0x28   : > { %p1146_p9 = pnand %p1144_p8, %p1141_p6 }
  0x2a   : > { %1149 = shalt.err (!%p1146_p9)
}
  0x2b   : > { %s1150_s25 = scalar_lea.vmem %s1275_s27, 2048  ;;  %p1158_p13 = scmp.lt.s32.totalorder %s1275_s27, %s1275_s27 }
  0x2c   : > { %p1151_p10 = scmp.ne.s32.totalorder %s1275_s27, %s1150_s25  ;;  %p1159_p0 = scmp.lt.s32.totalorder %s1150_s25, %s1150_s25 }
  0x2e   : > { %p1153_p11 = pnand %p1151_p10, %p1287_p7  ;;  %p1160_p1 = por %p1159_p0, %p1158_p13 }
  0x30   : > { %p1154_p12 = pneg %p1153_p11 }
  0x32   : > { %p1161_p4 = pnand %p1160_p1, %p1154_p12 }
  0x34   : > { %1164 = shalt.err (!%p1161_p4)
}
  0x35   : > { %1080 = dma.hbm_to_vmem [thread:$0]  (!%p1271_p5), %s1433_s1, 2048, %s1275_s27, [#allocation3], %s1212_s16, %s1212_s16, %s1213_s17  }
  0x36   : > { %s1165_s15 = scalar_lea.hbm %s1436_s4, 2048 }
  0x37   : > { %p1166_p2 = scmp.ne.s32.totalorder %s1436_s4, %s1165_s15  ;;  %p1172_p8 = scmp.lt.u32.totalorder %s1165_s15, %s1436_s4 }
  0x39   : > { %p1168_p3 = pnand %p1166_p2, %p1287_p7 }
  0x3b   : > { %p1169_p6 = pneg %p1168_p3 }
  0x3d   : > { %p1174_p9 = pnand %p1172_p8, %p1169_p6 }
  0x3f   : > { %1177 = shalt.err (!%p1174_p9)
}
  0x40   : > { %s1178_s27 = scalar_lea.vmem %s1277_s30, 2048  ;;  %p1186_p13 = scmp.lt.s32.totalorder %s1277_s30, %s1277_s30 }
  0x41   : > { %p1179_p10 = scmp.ne.s32.totalorder %s1277_s30, %s1178_s27  ;;  %p1187_p0 = scmp.lt.s32.totalorder %s1178_s27, %s1178_s27 }
  0x43   : > { %p1181_p11 = pnand %p1179_p10, %p1287_p7  ;;  %p1188_p1 = por %p1187_p0, %p1186_p13 }
  0x45   : > { %p1182_p12 = pneg %p1181_p11 }
  0x47   : > { %p1189_p4 = pnand %p1188_p1, %p1182_p12 }
  0x49   : > { %1192 = shalt.err (!%p1189_p4)
}
  0x4a   : > { %1086 = dma.hbm_to_vmem [thread:$0]  (!%p1271_p5), %s1436_s4, 2048, %s1277_s30, [#allocation5], %s1212_s16, %s1212_s16, %s1213_s17  }
  0x4b   : > { %p1444_p2 = scmp.ne.s32.totalorder %s1441_s23, 0 }
  0x4c   : > { %p1445_p7 = scmp.eq.s32.totalorder (!%p1444_p2), %s1258_s22, 0 }
  0x4d   : > { %247 = sbr.rel (%p1444_p2) target bundleno = 987 (0x3db), region = 44 }
  0x54   : > { %1198 = dma.done.wait (%p1445_p7), [#allocation3], 2048   ;;  %p1446_p3 = pmov %p1445_p7 }
  0x56   : > { %1200 = vsyncadd (%p1446_p3), [#allocation3], 4294965248  ;;  %p1447_p6 = pmov %p1446_p3 }
  0x57   : > { %p1448_p8 = pmov %p1446_p3 }
  0x58   : > { %1202 = dma.done.wait (%p1447_p6), [#allocation5], 6144  }
  0x59   : > { %1204 = vsyncadd (%p1448_p8), [#allocation5], 4294961152  ;;  %v1214_v0 = vmov 0.0|0.0   ;;  %vm1215_vm0 = vmmov 0   ;;  %v1216_v1 = vmov 0.0   ;;  %v293_v2 = vld [vmem:[#allocation2] sm:$0xff] }
  0x5a   : > { %969 = vmatprep.subr.bf16.mxu0 %v1214_v0  ;;  %861 = vmatprep.mubr.msk.f32.mxu0 %vm1215_vm0, %v1216_v1  ;;  %v294_v3 = vld [vmem:[#allocation2 + $0x8] sm:$0xff]  ;;  %v295_v4 = vld [vmem:[#allocation2 + $0x10] sm:$0xff]  ;;  %v296_v6 = vld [vmem:[#allocation2 + $0x18] sm:$0xff]  ;;  %p283_p5 = scmp.lt.s32.totalorder %s1258_s22, 1 }
  0x5b   : > { %993 = vmatprep.subr.bf16.mxu1 %v1214_v0  ;;  %896 = vmatprep.mubr.msk.f32.mxu1 %vm1215_vm0, %v1216_v1  ;;  %v970_v5 = vpack.c.bf16 %v294_v3, %v293_v2  ;;  %v973_v7 = vpack.c.bf16 %v296_v6, %v295_v4  ;;  %v297_v8 = vld [vmem:[#allocation2 + $0x20] sm:$0xff]  ;;  %v298_v9 = vld [vmem:[#allocation2 + $0x28] sm:$0xff]  ;;  %v386_v12 = vld [vmem:[#allocation4 + $0x10] sm:$0xff] }
  0x5c   : > { %v384_v10 = vld [vmem:[#allocation4] sm:$0xff]  ;;  %v385_v11 = vld [vmem:[#allocation4 + $0x8] sm:$0xff]  ;;  %v387_v13 = vld [vmem:[#allocation4 + $0x18] sm:$0xff]  ;;  %v976_v14 = vpack.c.bf16 %v298_v9, %v297_v8  ;;  %s1450_s22 = smov (!%p283_p5, %s1258_s22), 1 }
  0x5d   : > { %971 = vmatpush3.bf16.msra.mxu0 %v970_v5  ;;  %v994_v15 = vpack.c.bf16 %v385_v11, %v384_v10  ;;  %v299_v16 = vld [vmem:[#allocation2 + $0x30] sm:$0xff]  ;;  %v300_v17 = vld [vmem:[#allocation2 + $0x38] sm:$0xff]  ;;  %v997_v18 = vpack.c.bf16 %v387_v13, %v386_v12  ;;  %v388_v19 = vld [vmem:[#allocation4 + $0x20] sm:$0xff]  ;;  %s756_s23 = sshll.u32 %s1450_s22, 3  ;;  %v309_v10 = vlaneseq }
  0x5e   : > { %972 = vmatprep.subr.bf16.mxu0 %v1214_v0  ;;  %v389_v20 = vld [vmem:[#allocation4 + $0x28] sm:$0xff]  ;;  %v979_v21 = vpack.c.bf16 %v300_v17, %v299_v16  ;;  %v301_v22 = vld [vmem:[#allocation2 + $0x40] sm:$0xff]  ;;  %v390_v25 = vld [vmem:[#allocation4 + $0x30] sm:$0xff]  ;;  %s286_s12 = scalar_lea.vmem %s1432_s0, %s756_s23  ;;  %s290_s10 = scalar_lea.vmem %s1438_s6, %s756_s23 }
  0x5f   : > { %995 = vmatpush3.bf16.msra.mxu1 %v994_v15  ;;  %v302_v23 = vld [vmem:[#allocation2 + $0x48] sm:$0xff]  ;;  %v1000_v24 = vpack.c.bf16 %v389_v20, %v388_v19  ;;  %v391_v26 = vld [vmem:[#allocation4 + $0x38] sm:$0xff]  ;;  %v303_v28 = vld [vmem:[#allocation2 + $0x50] sm:$0xff]  ;;  %v310_v11 = vshrl.u32 %v309_v10, 7 }
  0x60   : > { %996 = vmatprep.subr.bf16.mxu1 %v1214_v0  ;;  %v982_v27 = vpack.c.bf16 %v302_v23, %v301_v22  ;;  %v304_v29 = vld [vmem:[#allocation2 + $0x58] sm:$0xff]  ;;  %v1003_v30 = vpack.c.bf16 %v391_v26, %v390_v25  ;;  %v392_v31 = vld [vmem:[#allocation4 + $0x40] sm:$0xff]  ;;  %v393_v32 = vld [vmem:[#allocation4 + $0x48] sm:$0xff] }
  0x61   : > { %974 = vmatpush3.bf16.msra.mxu0 %v973_v7  ;;  %v985_v33 = vpack.c.bf16 %v304_v29, %v303_v28  ;;  %v305_v34 = vld [vmem:[#allocation2 + $0x60] sm:$0xff]  ;;  %v306_v35 = vld [vmem:[#allocation2 + $0x68] sm:$0xff]  ;;  %v1006_v36 = vpack.c.bf16 %v393_v32, %v392_v31  ;;  %v394_v37 = vld [vmem:[#allocation4 + $0x50] sm:$0xff]  ;;  %v311_v12 = vsub.s32 0, %v310_v11 }
  0x62   : > { %975 = vmatprep.subr.bf16.mxu0 %v1214_v0  ;;  %v395_v38 = vld [vmem:[#allocation4 + $0x58] sm:$0xff]  ;;  %v988_v39 = vpack.c.bf16 %v306_v35, %v305_v34  ;;  %v307_v40 = vld [vmem:[#allocation2 + $0x70] sm:$0xff]  ;;  %v396_v43 = vld [vmem:[#allocation4 + $0x60] sm:$0xff] }
  0x63   : > { %998 = vmatpush3.bf16.msra.mxu1 %v997_v18  ;;  %v308_v41 = vld [vmem:[#allocation2 + $0x78] sm:$0xff]  ;;  %v1009_v42 = vpack.c.bf16 %v395_v38, %v394_v37  ;;  %v397_v44 = vld [vmem:[#allocation4 + $0x68] sm:$0xff]  ;;  %v292_v47 = vld [vmem:[%s286_s12] sm:$0xff] }
  0x64   : > { %999 = vmatprep.subr.bf16.mxu1 %v1214_v0  ;;  %v991_v45 = vpack.c.bf16 %v308_v41, %v307_v40  ;;  %v1012_v46 = vpack.c.bf16 %v397_v44, %v396_v43  ;;  %v398_v48 = vld [vmem:[#allocation4 + $0x70] sm:$0xff]  ;;  %v399_v49 = vld [vmem:[#allocation4 + $0x78] sm:$0xff]  ;;  %v476_v51 = vld [vmem:[#allocation4 + $0x80] sm:$0xff] }
  0x65   : > { %977 = vmatpush3.bf16.msra.mxu0 %v976_v14  ;;  %v1015_v50 = vpack.c.bf16 %v399_v49, %v398_v48  ;;  %v477_v52 = vld [vmem:[#allocation4 + $0x88] sm:$0xff]  ;;  %v478_v53 = vld [vmem:[#allocation4 + $0x90] sm:$0xff]  ;;  %v479_v55 = vld [vmem:[#allocation4 + $0x98] sm:$0xff] }
  0x66   : > { %978 = vmatprep.subr.bf16.mxu0 %v1214_v0  ;;  %v1018_v54 = vpack.c.bf16 %v477_v52, %v476_v51  ;;  %v1021_v56 = vpack.c.bf16 %v479_v55, %v478_v53  ;;  %v480_v57 = vld [vmem:[#allocation4 + $0xa0] sm:$0xff]  ;;  %v481_v58 = vld [vmem:[#allocation4 + $0xa8] sm:$0xff]  ;;  %v482_v60 = vld [vmem:[#allocation4 + $0xb0] sm:$0xff]  ;;  %v494_v51 = vsub.s32 2, %v310_v11 }
  0x67   : > { %1001 = vmatpush3.bf16.msra.mxu1 %v1000_v24  ;;  %v1024_v59 = vpack.c.bf16 %v481_v58, %v480_v57  ;;  %v483_v61 = vld [vmem:[#allocation4 + $0xb8] sm:$0xff]  ;;  %v484_v63 = vld [vmem:[#allocation4 + $0xc0] sm:$0xff]  ;;  %v485_v2 = vld [vmem:[#allocation4 + $0xc8] sm:$0xff] }
  0x68   : > { %1002 = vmatprep.subr.bf16.mxu1 %v1214_v0  ;;  %v1027_v62 = vpack.c.bf16 %v483_v61, %v482_v60  ;;  %v1030_v3 = vpack.c.bf16 %v485_v2, %v484_v63  ;;  %v486_v4 = vld [vmem:[#allocation4 + $0xd0] sm:$0xff]  ;;  %v487_v5 = vld [vmem:[#allocation4 + $0xd8] sm:$0xff]  ;;  %v488_v7 = vld [vmem:[#allocation4 + $0xe0] sm:$0xff] }
  0x69   : > { %980 = vmatpush3.bf16.msra.mxu0 %v979_v21  ;;  %v1033_v6 = vpack.c.bf16 %v487_v5, %v486_v4  ;;  %v489_v8 = vld [vmem:[#allocation4 + $0xe8] sm:$0xff]  ;;  %v291_v13 = vld [vmem:[%s1435_s3] sm:$0x7]  ;;  %v490_v19 = vld [vmem:[#allocation4 + $0xf0] sm:$0xff] }
  0x6a   : > { %981 = vmatprep.subr.bf16.mxu0 %v1214_v0  ;;  %v1036_v9 = vpack.c.bf16 %v489_v8, %v488_v7  ;;  %v312_v14 = vrot.slane %v291_v13, %v311_v12  ;;  %v491_v20 = vld [vmem:[#allocation4 + $0xf8] sm:$0xff]  ;;  %v567_v22 = vld [vmem:[#allocation6] sm:$0xff]  ;;  %v568_v23 = vld [vmem:[#allocation6 + $0x8] sm:$0xff]  ;;  %v495_v52 = vrot.slane %v291_v13, %v494_v51 }
  0x6b   : > { %1004 = vmatpush3.bf16.msra.mxu1 %v1003_v30  ;;  %v1039_v21 = vpack.c.bf16 %v491_v20, %v490_v19  ;;  %v569_v24 = vld [vmem:[#allocation6 + $0x10] sm:$0xff]  ;;  %v1042_v25 = vpack.c.bf16 %v568_v23, %v567_v22  ;;  %v570_v26 = vld [vmem:[#allocation6 + $0x18] sm:$0xff]  ;;  %v571_v28 = vld [vmem:[#allocation6 + $0x20] sm:$0xff] }
  0x6c   : > { %1005 = vmatprep.subr.bf16.mxu1 %v1214_v0  ;;  %v572_v29 = vld [vmem:[#allocation6 + $0x28] sm:$0xff]  ;;  %v574_v31 = vld [vmem:[#allocation6 + $0x38] sm:$0xff]  ;;  %v581_v48 = vld [vmem:[#allocation6 + $0x70] sm:$0xff] }
  0x6d   : > { %983 = vmatpush3.bf16.msra.mxu0 %v982_v27  ;;  %v1045_v27 = vpack.c.bf16 %v570_v26, %v569_v24  ;;  %v1048_v30 = vpack.c.bf16 %v572_v29, %v571_v28  ;;  %v576_v34 = vld [vmem:[#allocation6 + $0x48] sm:$0xff]  ;;  %v578_v37 = vld [vmem:[#allocation6 + $0x58] sm:$0xff] }
  0x6e   : > { %984 = vmatprep.subr.bf16.mxu0 %v1214_v0  ;;  %v580_v40 = vld [vmem:[#allocation6 + $0x68] sm:$0xff]  ;;  %v582_v49 = vld [vmem:[#allocation6 + $0x78] sm:$0xff] }
  0x6f   : > { %1007 = vmatpush3.bf16.msra.mxu1 %v1006_v36  ;;  %v577_v36 = vld [vmem:[#allocation6 + $0x50] sm:$0xff] }
  0x70   : > { %1008 = vmatprep.subr.bf16.mxu1 %v1214_v0  ;;  %v1057_v38 = vpack.c.bf16 %v578_v37, %v577_v36 }
  0x71   : > { %986 = vmatpush3.bf16.msra.mxu0 %v985_v33  ;;  %v575_v33 = vld [vmem:[#allocation6 + $0x40] sm:$0xff] }
  0x72   : > { %987 = vmatprep.subr.bf16.mxu0 %v1214_v0  ;;  %v1054_v35 = vpack.c.bf16 %v576_v34, %v575_v33 }
  0x73   : > { %1010 = vmatpush3.bf16.msra.mxu1 %v1009_v42  ;;  %v402_v42 = vsub.s32 1, %v310_v11 }
  0x74   : > { %1011 = vmatprep.subr.bf16.mxu1 %v1214_v0 }
  0x75   : > { %989 = vmatpush3.bf16.msra.mxu0 %v988_v39  ;;  %v579_v39 = vld [vmem:[#allocation6 + $0x60] sm:$0xff]  ;;  %v403_v43 = vrot.slane %v291_v13, %v402_v42 }
  0x76   : > { %990 = vmatprep.subr.bf16.mxu0 %v1214_v0  ;;  %v1060_v41 = vpack.c.bf16 %v580_v40, %v579_v39 }
  0x77   : > { %1013 = vmatpush3.bf16.msra.mxu1 %v1012_v46 }
  0x78   : > { %1014 = vmatprep.subr.bf16.mxu1 %v1214_v0 }
  0x79   : > { %992 = vmatpush3.bf16.msra.mxu0 %v991_v45 }
  0x7a   : > { %1017 = vmatprep.subr.bf16.mxu0 %v1214_v0 }
  0x7b   : > { %1016 = vmatpush3.bf16.msra.mxu1 %v1015_v50  ;;  %v1063_v50 = vpack.c.bf16 %v582_v49, %v581_v48 }
  0x7c   : > { %862 = vmatmul.mubr.f32.vlgmr.msra.gmra.mrb[0].mxu0 %v292_v47  ;;  %1041 = vmatprep.subr.bf16.mxu1 %v1214_v0 }
  0x7d   : > { %931 = vmatprep.mubr.msk.f32.mxu0 %vm1215_vm0, %v1216_v1  ;;  %1019 = vmatpush3.bf16.msra.mxu0 %v1018_v54 }
  0x7e   : > { %1020 = vmatprep.subr.bf16.mxu0 %v1214_v0 }
  0x81   : > { %1022 = vmatpush3.bf16.msra.mxu0 %v1021_v56 }
  0x82   : > { %1023 = vmatprep.subr.bf16.mxu0 %v1214_v0 }
  0x85   : > { %1025 = vmatpush3.bf16.msra.mxu0 %v1024_v59 }
  0x86   : > { %1026 = vmatprep.subr.bf16.mxu0 %v1214_v0 }
  0x89   : > { %1028 = vmatpush3.bf16.msra.mxu0 %v1027_v62 }
  0x8a   : > { %1029 = vmatprep.subr.bf16.mxu0 %v1214_v0 }
  0x8d   : > { %1031 = vmatpush3.bf16.msra.mxu0 %v1030_v3 }
  0x8e   : > { %1032 = vmatprep.subr.bf16.mxu0 %v1214_v0 }
  0x91   : > { %1034 = vmatpush3.bf16.msra.mxu0 %v1033_v6 }
  0x92   : > { %1035 = vmatprep.subr.bf16.mxu0 %v1214_v0 }
  0x95   : > { %1037 = vmatpush3.bf16.msra.mxu0 %v1036_v9 }
  0x96   : > { %1038 = vmatprep.subr.bf16.mxu0 %v1214_v0 }
  0x99   : > { %1040 = vmatpush3.bf16.msra.mxu0 %v1039_v21 }
 0x14f   : > { %v379_v15 = vpop.f32.mrb[0].mxu0 }
 0x150   : > { %v380_v16 = vadd.f32 %v379_v15, %v312_v14  ;;  %v863_v17 = vpop.f32.mrb[1].mxu0 }
 0x152   : > { %v383_v18 = vmax.f32 %v380_v16, 0.0 }
 0x154   : > { %897 = vmatmul.mubr.f32.vlgmr.msra.gmra.mrb[0].mxu1 %v383_v18 }
 0x155   : > { %966 = vmatprep.mubr.msk.f32.mxu1 %vm1215_vm0, %v1216_v1  ;;  %1043 = vmatpush3.bf16.msra.mxu1 %v1042_v25  ;;  %v573_v1 = vld [vmem:[#allocation6 + $0x30] sm:$0xff] }
 0x156   : > { %1044 = vmatprep.subr.bf16.mxu1 %v1214_v0  ;;  %v1051_v32 = vpack.c.bf16 %v574_v31, %v573_v1 }
 0x159   : > { %1046 = vmatpush3.bf16.msra.mxu1 %v1045_v27 }
 0x15a   : > { %1047 = vmatprep.subr.bf16.mxu1 %v1214_v0 }
 0x15d   : > { %1049 = vmatpush3.bf16.msra.mxu1 %v1048_v30 }
 0x15e   : > { %1050 = vmatprep.subr.bf16.mxu1 %v1214_v0 }
 0x161   : > { %1052 = vmatpush3.bf16.msra.mxu1 %v1051_v32 }
 0x162   : > { %1053 = vmatprep.subr.bf16.mxu1 %v1214_v0 }
 0x165   : > { %1055 = vmatpush3.bf16.msra.mxu1 %v1054_v35 }
 0x166   : > { %1056 = vmatprep.subr.bf16.mxu1 %v1214_v0 }
 0x169   : > { %1058 = vmatpush3.bf16.msra.mxu1 %v1057_v38 }
 0x16a   : > { %1059 = vmatprep.subr.bf16.mxu1 %v1214_v0 }
 0x16d   : > { %1061 = vmatpush3.bf16.msra.mxu1 %v1060_v41 }
 0x16e   : > { %1062 = vmatprep.subr.bf16.mxu1 %v1214_v0  ;;  %v758_v0 = vld [vmem:[%s1437_s5] ss:$0 sm:$0xff] }
 0x171   : > { %1064 = vmatpush3.bf16.msra.mxu1 %v1063_v50 }
 0x227   : > { %v470_v44 = vpop.f32.mrb[0].mxu1 }
 0x228   : > { %v471_v45 = vadd.f32 %v470_v44, %v403_v43  ;;  %v898_v46 = vpop.f32.mrb[1].mxu1 }
 0x22a   : > { %v474_v47 = vmax.f32 %v471_v45, 0.0 }
 0x22c   : > { %932 = vmatmul.mubr.f32.vlgmr.msra.gmra.mrb[2].mxu0 %v474_v47 }
 0x2ff   : > { %v562_v53 = vpop.f32.mrb[2].mxu0 }
 0x300   : > { %v563_v54 = vadd.f32 %v562_v53, %v495_v52  ;;  %v933_v55 = vpop.f32.mrb[3].mxu0 }
 0x302   : > { %v566_v56 = vmax.f32 %v563_v54, 0.0 }
 0x304   : > { %967 = vmatmul.mubr.f32.vlgmr.msra.gmra.mrb[2].mxu1 %v566_v56 }
 0x3d7   : > { %v656_v57 = vpop.f32.mrb[2].mxu1 }
 0x3d8   : > { %v657_v58 = vadd.f32 %v758_v0, %v656_v57  ;;  %v968_v59 = vpop.f32.mrb[3].mxu1 }
 0x3da   : > { %660 = vst [vmem:[%s290_s10] sm:$0xff] %v657_v58 }
 0x3db PF: > { %s18_s21 = sadd.s32 1, %s1207_s21  }
 0x3dc   : > { %p15_p9 = scmp.ge.s32.totalorder %s18_s21, 4  }
 0x3de   :  { %17 = sbr.rel (!%p15_p9) target bundleno = 2 (0x2), region = 88 }
 0x3e5   :  { %680 = vsyncpa [#allocation3], 1 }
 0x3e6   :  { %682 = vsyncpa [#allocation3 + $0x1], 1 }
 0x3e7   :  { %683 = vsyncpa [#allocation5], 1 }

</bundles_post_ra>
